<compile_context>
chip_gen: v5e
topology: v5e:2x2
jax: 0.10.0
libtpu: 0.0.40
codegen_flags: <defaults>
</compile_context>

<pallas_src>
import jax
import jax.numpy as jnp
import numpy as np
from jax.experimental import pallas as pl
from jax.experimental.pallas import tpu as pltpu


def layer_attention_kernel(w_ref, x_ref, o_ref):
    # w_ref: (L, FT)      pre-normalized (softmax done in the wrapper)
    # x_ref: (L, BT, FT)  stacked layer-output tile
    # o_ref: (BT, FT)     weighted sum over layers
    num_layers = x_ref.shape[0]
    w = w_ref[...]                                     # (L, FT), tiny

    # Per-layer accumulate in f32; multiply stays in the input compute dtype
    # (bf16 mul + f32 acc when inputs are bf16, pure f32 otherwise).
    acc = (w[0:1, :] * x_ref[0]).astype(jnp.float32)   # (BT, FT)
    for l in range(1, num_layers):
        acc = acc + (w[l:l + 1, :] * x_ref[l]).astype(jnp.float32)

    o_ref[...] = acc.astype(o_ref.dtype)


def _tile_candidates(n, unit, cap):
    """Divisors of n that are multiples of `unit` (descending), or [n] if none."""
    cands = []
    c = unit
    while c <= min(n, cap):
        if n % c == 0:
            cands.append(c)
        c += unit
    if not cands:
        cands = [n]
    return sorted(set(cands), reverse=True)


def _choose_tiles(L, B, F, x_itemsize, w_itemsize, budget_bytes):
    """Largest lane-dense (B_TILE, F_TILE) whose double-buffered set fits budget."""
    ft_cands = _tile_candidates(F, 128, 4096)   # lane-dense, prefer large
    bt_cands = _tile_candidates(B, 8, 1024)
    for ft in ft_cands:
        for bt in bt_cands:
            per_step = (L * bt * ft * x_itemsize   # x tile
                        + L * ft * w_itemsize      # weight tile
                        + bt * ft * x_itemsize)    # output tile
            if 2 * per_step <= budget_bytes:       # double buffered
                return bt, ft
    return bt_cands[-1], ft_cands[-1]


def layer_attention(attention_weights, layer_outputs_stacked, *,
                    batch_tile=None, feat_tile=None):
    """attention_weights: (L, F); layer_outputs_stacked: (L, B, F) -> (B, F)."""
    L, F = attention_weights.shape
    Lx, B, Fx = layer_outputs_stacked.shape
    assert L == Lx and F == Fx

    x_dtype = jnp.dtype(layer_outputs_stacked.dtype)
    x_itemsize = x_dtype.itemsize

    # Softmax over the layer axis hoisted out of the kernel (tiny (L, F) op).
    # Keep weights in the compute dtype: bf16 if x is bf16 (bf16 VALU on
    # v6e/v7x), otherwise f32.
    compute_dtype = jnp.bfloat16 if x_dtype == jnp.dtype(jnp.bfloat16) else jnp.float32
    w_norm = jax.nn.softmax(attention_weights.astype(jnp.float32), axis=0)
    w_norm = w_norm.astype(compute_dtype)
    w_itemsize = jnp.dtype(compute_dtype).itemsize

    # Tile selection: biggest lane-dense tile whose double-buffered working
    # set fits a budget that is safe on v7x's 64 MiB VMEM.
    budget_bytes = 20 * 1024 * 1024
    bt_auto, ft_auto = _choose_tiles(L, B, F, x_itemsize, w_itemsize, budget_bytes)
    bt = batch_tile if batch_tile is not None else bt_auto
    ft = feat_tile if feat_tile is not None else ft_auto
    assert B % bt == 0, "batch dim must be divisible by the batch tile"
    assert F % ft == 0, "feature dim must be divisible by the feature tile"

    per_step = (L * bt * ft * x_itemsize
                + L * ft * w_itemsize
                + bt * ft * x_itemsize)
    # Explicit scoped-VMEM limit: double-buffered working set + headroom,
    # floored at 16 MiB and capped well under v7x's 64 MiB physical VMEM.
    vmem_limit = int(min(48 * 1024 * 1024,
                         max(16 * 1024 * 1024, 2 * per_step + (4 << 20))))

    grid = (B // bt, F // ft)

    return pl.pallas_call(
        layer_attention_kernel,
        out_shape=jax.ShapeDtypeStruct((B, F), x_dtype),
        grid_spec=pltpu.PrefetchScalarGridSpec(
            num_scalar_prefetch=0,
            grid=grid,
            in_specs=[
                pl.BlockSpec((L, ft), lambda b, f: (0, f)),
                pl.BlockSpec((L, bt, ft), lambda b, f: (0, b, f)),
            ],
            out_specs=pl.BlockSpec((bt, ft), lambda b, f: (b, f)),
        ),
        compiler_params=pltpu.CompilerParams(
            dimension_semantics=("parallel", "parallel"),
            vmem_limit_bytes=vmem_limit,
        ),
    )(w_norm, layer_outputs_stacked)


def kaiming_normal(key, shape, nonlinearity_slope=0.01):
    # nn.init.kaiming_normal_(mode='fan_in', nonlinearity='leaky_relu')
    fan_in = shape[1]
    gain = np.sqrt(2.0 / (1.0 + nonlinearity_slope ** 2))
    std = gain / np.sqrt(fan_in)
    return jax.random.normal(key, shape, dtype=jnp.float32) * std


def reference(attention_weights, layer_outputs_stacked):
    w = jax.nn.softmax(attention_weights, axis=0)         # (L, F)
    return jnp.sum(w[:, None, :] * layer_outputs_stacked, axis=0)


if __name__ == "__main__":
    num_layers, batch, num_feat = 4, 64, 1024

    key = jax.random.PRNGKey(0)
    k_w, k_x = jax.random.split(key)

    attention_weights = kaiming_normal(k_w, (num_layers, num_feat))
    # Stacked layer outputs: (L, B, F)
    layer_outputs = jax.random.normal(
        k_x, (num_layers, batch, num_feat), dtype=jnp.float32
    )

    ref = reference(attention_weights, layer_outputs)

    # Auto-tiled path.
    out = jax.block_until_ready(layer_attention(attention_weights, layer_outputs))
    np.testing.assert_allclose(np.asarray(out), np.asarray(ref), rtol=1e-5, atol=1e-5)

    # Explicit 2-D (batch, feature) grid path (exercises the pipeline with >1 step).
    out_tiled = jax.block_until_ready(
        layer_attention(attention_weights, layer_outputs, batch_tile=32, feat_tile=512)
    )
    np.testing.assert_allclose(np.asarray(out_tiled), np.asarray(ref), rtol=1e-5, atol=1e-5)

    print("KERNEL_OK")
</pallas_src>

<mosaic_0001>
module attributes {stable_mosaic.version = 11 : i64} {
  func.func @layer_attention_kernel(%arg0: i32, %arg1: i32, %arg2: memref<4x1024xf32, #tpu.memory_space<vmem>>, %arg3: memref<4x64x1024xf32, #tpu.memory_space<vmem>>, %arg4: memref<64x1024xf32, #tpu.memory_space<vmem>>) attributes {dimension_semantics = [#tpu.dimension_semantics<parallel>, #tpu.dimension_semantics<parallel>], iteration_bounds = array<i64: 1, 1>, scalar_prefetch = 0 : i64, scratch_operands = 0 : i64, tpu.core_type = #tpu.core_type<tc>, window_params = [{transform_indices = @transform_0, window_bounds = array<i64: 4, 1024>}, {transform_indices = @transform_1, window_bounds = array<i64: 4, 64, 1024>}, {transform_indices = @transform_2, window_bounds = array<i64: 64, 1024>}]} {
    %c0 = arith.constant 0 : index
    %c0_0 = arith.constant 0 : index
    %0 = vector.load %arg2[%c0, %c0_0] : memref<4x1024xf32, #tpu.memory_space<vmem>>, vector<4x1024xf32>
    %1 = vector.extract_strided_slice %0 {offsets = [0, 0], sizes = [1, 1024], strides = [1, 1]} : vector<4x1024xf32> to vector<1x1024xf32>
    %c0_1 = arith.constant 0 : index
    %c0_2 = arith.constant 0 : index
    %c0_3 = arith.constant 0 : index
    %2 = vector.load %arg3[%c0_1, %c0_2, %c0_3] : memref<4x64x1024xf32, #tpu.memory_space<vmem>>, vector<1x64x1024xf32>
    %3 = vector.shape_cast %2 : vector<1x64x1024xf32> to vector<64x1024xf32>
    %4 = vector.broadcast %1 : vector<1x1024xf32> to vector<64x1024xf32>
    %5 = arith.mulf %4, %3 : vector<64x1024xf32>
    %6 = vector.extract_strided_slice %0 {offsets = [1, 0], sizes = [1, 1024], strides = [1, 1]} : vector<4x1024xf32> to vector<1x1024xf32>
    %c1 = arith.constant 1 : index
    %c0_4 = arith.constant 0 : index
    %c0_5 = arith.constant 0 : index
    %7 = vector.load %arg3[%c1, %c0_4, %c0_5] : memref<4x64x1024xf32, #tpu.memory_space<vmem>>, vector<1x64x1024xf32>
    %8 = vector.shape_cast %7 : vector<1x64x1024xf32> to vector<64x1024xf32>
    %9 = vector.broadcast %6 : vector<1x1024xf32> to vector<64x1024xf32>
    %10 = arith.mulf %9, %8 : vector<64x1024xf32>
    %11 = arith.addf %5, %10 : vector<64x1024xf32>
    %12 = vector.extract_strided_slice %0 {offsets = [2, 0], sizes = [1, 1024], strides = [1, 1]} : vector<4x1024xf32> to vector<1x1024xf32>
    %c2 = arith.constant 2 : index
    %c0_6 = arith.constant 0 : index
    %c0_7 = arith.constant 0 : index
    %13 = vector.load %arg3[%c2, %c0_6, %c0_7] : memref<4x64x1024xf32, #tpu.memory_space<vmem>>, vector<1x64x1024xf32>
    %14 = vector.shape_cast %13 : vector<1x64x1024xf32> to vector<64x1024xf32>
    %15 = vector.broadcast %12 : vector<1x1024xf32> to vector<64x1024xf32>
    %16 = arith.mulf %15, %14 : vector<64x1024xf32>
    %17 = arith.addf %11, %16 : vector<64x1024xf32>
    %18 = vector.extract_strided_slice %0 {offsets = [3, 0], sizes = [1, 1024], strides = [1, 1]} : vector<4x1024xf32> to vector<1x1024xf32>
    %c3 = arith.constant 3 : index
    %c0_8 = arith.constant 0 : index
    %c0_9 = arith.constant 0 : index
    %19 = vector.load %arg3[%c3, %c0_8, %c0_9] : memref<4x64x1024xf32, #tpu.memory_space<vmem>>, vector<1x64x1024xf32>
    %20 = vector.shape_cast %19 : vector<1x64x1024xf32> to vector<64x1024xf32>
    %21 = vector.broadcast %18 : vector<1x1024xf32> to vector<64x1024xf32>
    %22 = arith.mulf %21, %20 : vector<64x1024xf32>
    %23 = arith.addf %17, %22 : vector<64x1024xf32>
    %c0_10 = arith.constant 0 : index
    %c0_11 = arith.constant 0 : index
    %24 = vector.load %arg4[%c0_10, %c0_11] : memref<64x1024xf32, #tpu.memory_space<vmem>>, vector<64x1024xf32>
    tpu.vector_store %arg4[%c0_10, %c0_11], %23 {strides = array<i32>} : memref<64x1024xf32, #tpu.memory_space<vmem>>, vector<64x1024xf32>,
    return
  }
  func.func @transform_0(%arg0: i32, %arg1: i32) -> (i32, i32) {
    %c0_i32 = arith.constant 0 : i32
    %c0_i32_0 = arith.constant 0 : i32
    return %c0_i32, %arg1 : i32, i32
  }
  func.func @transform_1(%arg0: i32, %arg1: i32) -> (i32, i32, i32) {
    %c0_i32 = arith.constant 0 : i32
    %c0_i32_0 = arith.constant 0 : i32
    return %c0_i32, %arg0, %arg1 : i32, i32, i32
  }
  func.func @transform_2(%arg0: i32, %arg1: i32) -> (i32, i32) {
    %c0_i32 = arith.constant 0 : i32
    return %arg0, %arg1 : i32, i32
  }
}

</mosaic_0001>

<bundles_post_ra>
// kernel: tpu_custom_call.1
= control target key start
LH: loop header
LB: loop body
LE: loop exit
PB: predicated region body
PF: predicated region fallthrough
CT: control target
= control target key end

     0   :  { %7 = vsyncpa [#allocation3], 0  ;;  %s1375_s0 = inlined_call_operand.hbm [shape: f32[4,1024], index: 0, kind: input, shape index: {}]   ;;  %s1376_s1 = inlined_call_operand.hbm [shape: f32[4,64,1024], index: 1, kind: input, shape index: {}]   ;;  %s1377_s2 = inlined_call_operand.hbm [shape: f32[64,1024], index: 2, kind: output, shape index: {}]  }
   0x1   :  { %8 = vsyncpa [#allocation6], 0 }
   0x2   :  { %9 = vsyncpa [#allocation4], 0  ;;  %s15_s11 = sshll.u32 %s1375_s0, 4  ;;  %s1020_s12 = smov [#allocation2]   ;;  %s16_s11 = int_to_ptr.hbm [resolvable:$true] %s15_s11 }
   0x3   :  { %s17_s13 = sshll.u32 %s1020_s12, 4  ;;  %s25_s16 = sshll.u32 %s1376_s1, 4  ;;  %s18_s13 = int_to_ptr.vmem [resolvable:$true] %s17_s13  ;;  %s26_s16 = int_to_ptr.hbm [resolvable:$true] %s25_s16 }
   0x4   :  { %20 = dma.hbm_to_vmem [thread:$0]  %s16_s11, 512, %s18_s13, [#allocation3]  }
   0x5   :  { %s1021_s17 = smov [#allocation5]   ;;  %s1022_s19 = smov 1024  }
   0x6   :  { %s27_s18 = sshll.u32 %s1021_s17, 4  ;;  %s1023_s20 = smov 64   ;;  %s28_s18 = int_to_ptr.vmem [resolvable:$true] %s27_s18 }
   0x7   :  { %33 = dma.hbm_to_vmem [thread:$0]  %s26_s16, 32768, %s28_s18, [#allocation6], %s1022_s19, %s1022_s19, %s1023_s20  }
   0x8   :  { %1014 = dma.done.wait [#allocation3], 512  }
   0x9   :  { %1015 = vsyncadd [#allocation3], 4294966784 }
   0xa   :  { %1016 = dma.done.wait [#allocation6], 32768  }
   0xb   :  { %1017 = vsyncadd [#allocation6], 4294934528  ;;  %v42_v0 = vld [vmem:[#allocation2] sm:$0xff]  ;;  %v47_v9 = vld [vmem:[#allocation5 + $0x8] sm:$0xff]  ;;  %s1024_s0 = smov [#allocation7]   ;;  %s923_s23 = sshll.u32 %s1377_s2, 4  ;;  %s924_s23 = int_to_ptr.hbm [resolvable:$true] %s923_s23 }
   0xc   :  { %v46_v1 = vld [vmem:[#allocation5] sm:$0xff]  ;;  %v114_v2 = vperm.slane %v42_v0, 0  ;;  %v267_v4 = vperm.slane %v42_v0, 1  ;;  %v484_v5 = vperm.slane %v42_v0, 2  ;;  %v701_v6 = vperm.slane %v42_v0, 3  ;;  %v204_v17 = vld [vmem:[#allocation5 + $0x208] sm:$0xff] }
   0xd   :  { %v203_v3 = vld [vmem:[#allocation5 + $0x200] sm:$0xff]  ;;  %v115_v10 = vperm.slane %v42_v0, 4  ;;  %v268_v11 = vperm.slane %v42_v0, 5  ;;  %v485_v12 = vperm.slane %v42_v0, 6  ;;  %v421_v18 = vld [vmem:[#allocation5 + $0x408] sm:$0xff]  ;;  %v702_v22 = vperm.slane %v42_v0, 7 }
   0xe   :  { %v420_v7 = vld [vmem:[#allocation5 + $0x400] sm:$0xff]  ;;  %v1049_v13 = vperm.slane %v114_v2, 0  ;;  %v1051_v14 = vperm.slane %v267_v4, 1  ;;  %v1053_v15 = vperm.slane %v484_v5, 2  ;;  %v1055_v16 = vperm.slane %v701_v6, 3  ;;  %v43_v23 = vld [vmem:[#allocation2 + $0x8] sm:$0xff] }
   0xf   :  { %v637_v8 = vld [vmem:[#allocation5 + $0x600] sm:$0xff]  ;;  %v1057_v19 = vperm.slane %v115_v10, 0  ;;  %v1059_v20 = vperm.slane %v268_v11, 1  ;;  %v1061_v21 = vperm.slane %v485_v12, 2  ;;  %v638_v28 = vld [vmem:[#allocation5 + $0x608] sm:$0xff]  ;;  %v1070_v32 = vperm.slane %v702_v22, 3 }
  0x10   :  { %v138_v24 = vmul.f32 %v1049_v13, %v46_v1  ;;  %v291_v25 = vmul.f32 %v1051_v14, %v203_v3  ;;  %v508_v26 = vmul.f32 %v1053_v15, %v420_v7  ;;  %v725_v27 = vmul.f32 %v1055_v16, %v637_v8  ;;  %v48_v39 = vld [vmem:[#allocation5 + $0x10] sm:$0xff]  ;;  %v49_v49 = vld [vmem:[#allocation5 + $0x18] sm:$0xff]  ;;  %v50_v7 = vld [vmem:[#allocation5 + $0x20] sm:$0xff]  ;;  %s921_s1 = sshll.u32 %s1024_s0, 4  ;;  %s922_s1 = int_to_ptr.vmem [resolvable:$true] %s921_s1 }
  0x11   :  { %v139_v29 = vmul.f32 %v1057_v19, %v47_v9  ;;  %v292_v30 = vmul.f32 %v1059_v20, %v204_v17  ;;  %v509_v31 = vmul.f32 %v1061_v21, %v421_v18  ;;  %v116_v34 = vperm.slane %v43_v23, 0  ;;  %v205_v40 = vld [vmem:[#allocation5 + $0x210] sm:$0xff]  ;;  %v206_v59 = vld [vmem:[#allocation5 + $0x218] sm:$0xff]  ;;  %v207_v22 = vld [vmem:[#allocation5 + $0x220] sm:$0xff] }
  0x12   :  { %v355_v33 = vadd.f32 %v291_v25, %v138_v24  ;;  %v269_v35 = vperm.slane %v43_v23, 1  ;;  %v486_v36 = vperm.slane %v43_v23, 2  ;;  %v726_v38 = vmul.f32 %v1070_v32, %v638_v28  ;;  %v422_v41 = vld [vmem:[#allocation5 + $0x410] sm:$0xff]  ;;  %v423_v1 = vld [vmem:[#allocation5 + $0x418] sm:$0xff]  ;;  %v424_v24 = vld [vmem:[#allocation5 + $0x420] sm:$0xff] }
  0x13   :  { %v356_v37 = vadd.f32 %v292_v30, %v139_v29  ;;  %v703_v42 = vperm.slane %v43_v23, 3  ;;  %v117_v43 = vperm.slane %v43_v23, 4  ;;  %v1073_v45 = vperm.slane %v116_v34, 0  ;;  %v639_v48 = vld [vmem:[#allocation5 + $0x610] sm:$0xff]  ;;  %v640_v6 = vld [vmem:[#allocation5 + $0x618] sm:$0xff]  ;;  %v641_v25 = vld [vmem:[#allocation5 + $0x620] sm:$0xff] }
  0x14   :  { %v572_v44 = vadd.f32 %v508_v26, %v355_v33  ;;  %v1075_v46 = vperm.slane %v269_v35, 1  ;;  %v1077_v47 = vperm.slane %v486_v36, 2  ;;  %v270_v53 = vperm.slane %v43_v23, 5  ;;  %v44_v54 = vld [vmem:[#allocation2 + $0x10] sm:$0xff]  ;;  %v45_v34 = vld [vmem:[#allocation2 + $0x18] sm:$0xff] }
  0x15   :  { %v573_v50 = vadd.f32 %v509_v31, %v356_v37  ;;  %v1079_v51 = vperm.slane %v703_v42, 3  ;;  %v1081_v52 = vperm.slane %v117_v43, 0  ;;  %v140_v56 = vmul.f32 %v1073_v45, %v48_v39 }
  0x16   :  { %1380 = vst [vmem:[#allocation11_spill] sm:$0xff] %v1077_v47  ;;  %v789_v55 = vadd.f32 %v725_v27, %v572_v44  ;;  %v293_v57 = vmul.f32 %v1075_v46, %v205_v40  ;;  %v510_v58 = vmul.f32 %v1077_v47, %v422_v41  ;;  %v1088_v63 = vperm.slane %v270_v53, 1  ;;  %v51_v40 = vld [vmem:[#allocation5 + $0x28] sm:$0xff] }
  0x17   :  { %v790_v60 = vadd.f32 %v726_v38, %v573_v50  ;;  %v727_v61 = vmul.f32 %v1079_v51, %v639_v48  ;;  %v141_v62 = vmul.f32 %v1081_v52, %v49_v49  ;;  %v487_v2 = vperm.slane %v43_v23, 6  ;;  %v208_v49 = vld [vmem:[#allocation5 + $0x228] sm:$0xff] }
  0x18   :  { %853 = vst [vmem:[#allocation7] sm:$0xff] %v789_v55  ;;  %v357_v0 = vadd.f32 %v293_v57, %v140_v56  ;;  %v704_v3 = vperm.slane %v43_v23, 7  ;;  %v118_v4 = vperm.slane %v44_v54, 0  ;;  %v294_v5 = vmul.f32 %v1088_v63, %v206_v59  ;;  %v425_v50 = vld [vmem:[#allocation5 + $0x428] sm:$0xff] }
  0x19   :  { %854 = vst [vmem:[#allocation7 + $0x8] sm:$0xff] %v790_v60  ;;  %v271_v8 = vperm.slane %v44_v54, 1  ;;  %v488_v9 = vperm.slane %v44_v54, 2  ;;  %v705_v10 = vperm.slane %v44_v54, 3  ;;  %v1091_v12 = vperm.slane %v487_v2, 2  ;;  %v642_v53 = vld [vmem:[#allocation5 + $0x628] sm:$0xff] }
  0x1a   :  { %v574_v11 = vadd.f32 %v510_v58, %v357_v0  ;;  %v1093_v17 = vperm.slane %v704_v3, 3  ;;  %v1095_v18 = vperm.slane %v118_v4, 0  ;;  %v358_v23 = vadd.f32 %v294_v5, %v141_v62  ;;  %v209_v62 = vld [vmem:[#allocation5 + $0x230] sm:$0xff] }
  0x1b   :  { %v1097_v26 = vperm.slane %v271_v8, 1  ;;  %v1099_v27 = vperm.slane %v488_v9, 2  ;;  %v1101_v28 = vperm.slane %v705_v10, 3  ;;  %v511_v30 = vmul.f32 %v1091_v12, %v423_v1  ;;  %v426_v10 = vld [vmem:[#allocation5 + $0x430] sm:$0xff] }
  0x1c   :  { %v791_v29 = vadd.f32 %v727_v61, %v574_v11  ;;  %v728_v31 = vmul.f32 %v1093_v17, %v640_v6  ;;  %v142_v33 = vmul.f32 %v1095_v18, %v50_v7  ;;  %v119_v38 = vperm.slane %v44_v54, 4  ;;  %v52_v61 = vld [vmem:[#allocation5 + $0x30] sm:$0xff] }
  0x1d   :  { %v295_v35 = vmul.f32 %v1097_v26, %v207_v22  ;;  %v512_v36 = vmul.f32 %v1099_v27, %v424_v24  ;;  %v729_v37 = vmul.f32 %v1101_v28, %v641_v25  ;;  %v575_v39 = vadd.f32 %v511_v30, %v358_v23  ;;  %v643_v25 = vld [vmem:[#allocation5 + $0x630] sm:$0xff]  ;;  %v53_v23 = vld [vmem:[#allocation5 + $0x38] sm:$0xff] }
  0x1e   :  { %855 = vst [vmem:[#allocation7 + $0x10] sm:$0xff] %v791_v29  ;;  %v272_v41 = vperm.slane %v44_v54, 5  ;;  %v489_v42 = vperm.slane %v44_v54, 6  ;;  %v706_v43 = vperm.slane %v44_v54, 7  ;;  %v1109_v48 = vperm.slane %v119_v38, 0 }
  0x1f   :  { %v359_v44 = vadd.f32 %v295_v35, %v142_v33  ;;  %v120_v55 = vperm.slane %v45_v34, 0  ;;  %v273_v56 = vperm.slane %v45_v34, 1  ;;  %v792_v57 = vadd.f32 %v728_v31, %v575_v39  ;;  %v54_v31 = vld [vmem:[#allocation5 + $0x40] sm:$0xff] }
  0x20   :  { %v1111_v58 = vperm.slane %v272_v41, 1  ;;  %v1113_v59 = vperm.slane %v489_v42, 2  ;;  %v1115_v60 = vperm.slane %v706_v43, 3  ;;  %v143_v54 = vmul.f32 %v1109_v48, %v51_v40 }
  0x21   :  { %v576_v0 = vadd.f32 %v512_v36, %v359_v44  ;;  %v1118_v1 = vperm.slane %v120_v55, 0  ;;  %v1120_v2 = vperm.slane %v273_v56, 1  ;;  %856 = vst [vmem:[#allocation7 + $0x18] sm:$0xff] %v792_v57  ;;  %v490_v6 = vperm.slane %v45_v34, 2  ;;  %v210_v36 = vld [vmem:[#allocation5 + $0x238] sm:$0xff] }
  0x22   :  { %v296_v3 = vmul.f32 %v1111_v58, %v208_v49  ;;  %v513_v4 = vmul.f32 %v1113_v59, %v425_v50  ;;  %v730_v5 = vmul.f32 %v1115_v60, %v642_v53  ;;  %v707_v11 = vperm.slane %v45_v34, 3  ;;  %v644_v44 = vld [vmem:[#allocation5 + $0x638] sm:$0xff]  ;;  %v211_v49 = vld [vmem:[#allocation5 + $0x240] sm:$0xff] }
  0x23   :  { %v793_v7 = vadd.f32 %v729_v37, %v576_v0  ;;  %v144_v8 = vmul.f32 %v1118_v1, %v52_v61  ;;  %v297_v9 = vmul.f32 %v1120_v2, %v209_v62  ;;  %v1127_v24 = vperm.slane %v490_v6, 2  ;;  %v427_v37 = vld [vmem:[#allocation5 + $0x438] sm:$0xff]  ;;  %v428_v50 = vld [vmem:[#allocation5 + $0x440] sm:$0xff]  ;;  %v429_v6 = vld [vmem:[#allocation5 + $0x448] sm:$0xff] }
  0x24   :  { %v360_v22 = vadd.f32 %v296_v3, %v143_v54  ;;  %v121_v29 = vperm.slane %v45_v34, 4  ;;  %v274_v30 = vperm.slane %v45_v34, 5  ;;  %v1129_v35 = vperm.slane %v707_v11, 3  ;;  %v645_v61 = vld [vmem:[#allocation5 + $0x640] sm:$0xff] }
  0x25   :  { %857 = vst [vmem:[#allocation7 + $0x20] sm:$0xff] %v793_v7  ;;  %v361_v33 = vadd.f32 %v297_v9, %v144_v8  ;;  %v491_v38 = vperm.slane %v45_v34, 6  ;;  %v708_v39 = vperm.slane %v45_v34, 7  ;;  %v514_v41 = vmul.f32 %v1127_v24, %v426_v10  ;;  %v55_v34 = vld [vmem:[#allocation5 + $0x48] sm:$0xff] }
  0x26   :  { %v577_v40 = vadd.f32 %v513_v4, %v360_v22  ;;  %v1132_v42 = vperm.slane %v121_v29, 0  ;;  %v1134_v43 = vperm.slane %v274_v30, 1  ;;  %v731_v53 = vmul.f32 %v1129_v35, %v643_v25  ;;  %v212_v4 = vld [vmem:[#allocation5 + $0x248] sm:$0xff]  ;;  %v56_v22 = vld [vmem:[#allocation5 + $0x50] sm:$0xff] }
  0x27   :  { %v1137_v55 = vperm.slane %v491_v38, 2  ;;  %v1139_v56 = vperm.slane %v708_v39, 3  ;;  %v146_v57 = vmul.f32 %v1049_v13, %v54_v31  ;;  %v578_v0 = vadd.f32 %v514_v41, %v361_v33  ;;  %v646_v7 = vld [vmem:[#allocation5 + $0x648] sm:$0xff]  ;;  %v213_v25 = vld [vmem:[#allocation5 + $0x250] sm:$0xff]  ;;  %v214_v41 = vld [vmem:[#allocation5 + $0x258] sm:$0xff] }
  0x28   :  { %v794_v62 = vadd.f32 %v730_v5, %v577_v40  ;;  %v145_v54 = vmul.f32 %v1132_v42, %v53_v23  ;;  %v298_v3 = vmul.f32 %v1134_v43, %v210_v36  ;;  %v299_v10 = vmul.f32 %v1051_v14, %v211_v49  ;;  %v430_v29 = vld [vmem:[#allocation5 + $0x450] sm:$0xff]  ;;  %v57_v36 = vld [vmem:[#allocation5 + $0x58] sm:$0xff] }
  0x29   :  { %v515_v8 = vmul.f32 %v1137_v55, %v427_v37  ;;  %v732_v9 = vmul.f32 %v1139_v56, %v644_v44  ;;  %v516_v11 = vmul.f32 %v1053_v15, %v428_v50  ;;  %v795_v5 = vadd.f32 %v731_v53, %v578_v0  ;;  %v647_v33 = vld [vmem:[#allocation5 + $0x650] sm:$0xff]  ;;  %v431_v44 = vld [vmem:[#allocation5 + $0x458] sm:$0xff] }
  0x2a   :  { %858 = vst [vmem:[#allocation7 + $0x28] sm:$0xff] %v794_v62  ;;  %v362_v30 = vadd.f32 %v298_v3, %v145_v54  ;;  %v733_v23 = vmul.f32 %v1055_v16, %v645_v61  ;;  %v147_v31 = vmul.f32 %v1057_v19, %v55_v34  ;;  %v363_v38 = vadd.f32 %v299_v10, %v146_v57  ;;  %v648_v34 = vld [vmem:[#allocation5 + $0x658] sm:$0xff]  ;;  %v58_v62 = vld [vmem:[#allocation5 + $0x60] sm:$0xff] }
  0x2b   :  { %v300_v37 = vmul.f32 %v1059_v20, %v212_v4  ;;  %v517_v39 = vmul.f32 %v1061_v21, %v429_v6  ;;  %v734_v40 = vmul.f32 %v1070_v32, %v646_v7  ;;  %859 = vst [vmem:[#allocation7 + $0x30] sm:$0xff] %v795_v5  ;;  %v148_v50 = vmul.f32 %v1073_v45, %v56_v22  ;;  %v215_v4 = vld [vmem:[#allocation5 + $0x260] sm:$0xff] }
  0x2c   :  { %v579_v49 = vadd.f32 %v515_v8, %v362_v30  ;;  %v301_v53 = vmul.f32 %v1075_v46, %v213_v25  ;;  %v518_v61 = vmul.f32 %v1077_v47, %v430_v29  ;;  %v580_v0 = vadd.f32 %v516_v11, %v363_v38  ;;  %v432_v6 = vld [vmem:[#allocation5 + $0x460] sm:$0xff]  ;;  %v59_v25 = vld [vmem:[#allocation5 + $0x68] sm:$0xff] }
  0x2d   :  { %v364_v57 = vadd.f32 %v300_v37, %v147_v31  ;;  %v735_v54 = vmul.f32 %v1079_v51, %v647_v33  ;;  %v149_v3 = vmul.f32 %v1081_v52, %v57_v36  ;;  %v302_v8 = vmul.f32 %v1088_v63, %v214_v41  ;;  %v649_v5 = vld [vmem:[#allocation5 + $0x660] sm:$0xff]  ;;  %v216_v30 = vld [vmem:[#allocation5 + $0x268] sm:$0xff] }
  0x2e   :  { %v796_v7 = vadd.f32 %v732_v9, %v579_v49  ;;  %v365_v10 = vadd.f32 %v301_v53, %v148_v50  ;;  %v519_v22 = vmul.f32 %v1091_v12, %v431_v44  ;;  %v797_v29 = vadd.f32 %v733_v23, %v580_v0  ;;  %v433_v33 = vld [vmem:[#allocation5 + $0x468] sm:$0xff]  ;;  %v60_v49 = vld [vmem:[#allocation5 + $0x70] sm:$0xff] }
  0x2f   :  { %v581_v47 = vadd.f32 %v517_v39, %v364_v57  ;;  %v736_v11 = vmul.f32 %v1093_v17, %v648_v34  ;;  %v150_v31 = vmul.f32 %v1095_v18, %v58_v62  ;;  %v366_v38 = vadd.f32 %v302_v8, %v149_v3  ;;  %v650_v41 = vld [vmem:[#allocation5 + $0x668] sm:$0xff]  ;;  %v217_v44 = vld [vmem:[#allocation5 + $0x270] sm:$0xff]  ;;  %v435_v8 = vld [vmem:[#allocation5 + $0x478] sm:$0xff] }
  0x30   :  { %860 = vst [vmem:[#allocation7 + $0x38] sm:$0xff] %v796_v7  ;;  %v582_v36 = vadd.f32 %v518_v61, %v365_v10  ;;  %v303_v9 = vmul.f32 %v1097_v26, %v215_v4  ;;  %v520_v37 = vmul.f32 %v1099_v27, %v432_v6  ;;  %v737_v23 = vmul.f32 %v1101_v28, %v649_v5  ;;  %v434_v34 = vld [vmem:[#allocation5 + $0x470] sm:$0xff]  ;;  %v61_v4 = vld [vmem:[#allocation5 + $0x78] sm:$0xff] }
  0x31   :  { %861 = vst [vmem:[#allocation7 + $0x40] sm:$0xff] %v797_v29  ;;  %v798_v50 = vadd.f32 %v734_v40, %v581_v47  ;;  %v151_v39 = vmul.f32 %v1109_v48, %v59_v25  ;;  %v304_v53 = vmul.f32 %v1111_v58, %v216_v30  ;;  %v651_v62 = vld [vmem:[#allocation5 + $0x670] sm:$0xff]  ;;  %v583_v61 = vadd.f32 %v519_v22, %v366_v38  ;;  %v218_v6 = vld [vmem:[#allocation5 + $0x278] sm:$0xff]  ;;  %v62_v25 = vld [vmem:[#allocation5 + $0x80] sm:$0xff] }
  0x32   :  { %v799_v0 = vadd.f32 %v735_v54, %v582_v36  ;;  %v367_v57 = vadd.f32 %v303_v9, %v150_v31  ;;  %v521_v3 = vmul.f32 %v1113_v59, %v433_v33  ;;  %v738_v10 = vmul.f32 %v1115_v60, %v650_v41  ;;  %v652_v5 = vld [vmem:[#allocation5 + $0x678] sm:$0xff]  ;;  %v219_v31 = vld [vmem:[#allocation5 + $0x280] sm:$0xff] }
  0x33   :  { %862 = vst [vmem:[#allocation7 + $0x48] sm:$0xff] %v798_v50  ;;  %v368_v7 = vadd.f32 %v304_v53, %v151_v39  ;;  %v152_v47 = vmul.f32 %v1118_v1, %v60_v49  ;;  %v305_v40 = vmul.f32 %v1120_v2, %v217_v44  ;;  %v800_v30 = vadd.f32 %v736_v11, %v583_v61  ;;  %v436_v33 = vld [vmem:[#allocation5 + $0x480] sm:$0xff]  ;;  %v63_v44 = vld [vmem:[#allocation5 + $0x88] sm:$0xff] }
  0x34   :  { %863 = vst [vmem:[#allocation7 + $0x50] sm:$0xff] %v799_v0  ;;  %v584_v54 = vadd.f32 %v520_v37, %v367_v57  ;;  %v522_v22 = vmul.f32 %v1127_v24, %v434_v34  ;;  %v739_v29 = vmul.f32 %v1129_v35, %v651_v62  ;;  %v153_v9 = vmul.f32 %v1132_v42, %v61_v4  ;;  %v653_v49 = vld [vmem:[#allocation5 + $0x680] sm:$0xff]  ;;  %v220_v50 = vld [vmem:[#allocation5 + $0x288] sm:$0xff]  ;;  %v64_v4 = vld [vmem:[#allocation5 + $0x90] sm:$0xff] }
  0x35   :  { %v585_v36 = vadd.f32 %v521_v3, %v368_v7  ;;  %v369_v38 = vadd.f32 %v305_v40, %v152_v47  ;;  %v306_v41 = vmul.f32 %v1134_v43, %v218_v6  ;;  %864 = vst [vmem:[#allocation7 + $0x58] sm:$0xff] %v800_v30  ;;  %v523_v11 = vmul.f32 %v1137_v55, %v435_v8  ;;  %v437_v34 = vld [vmem:[#allocation5 + $0x488] sm:$0xff]  ;;  %v221_v6 = vld [vmem:[#allocation5 + $0x290] sm:$0xff] }
  0x36   :  { %v801_v39 = vadd.f32 %v737_v23, %v584_v54  ;;  %v740_v37 = vmul.f32 %v1139_v56, %v652_v5  ;;  %v154_v53 = vmul.f32 %v1049_v13, %v62_v25  ;;  %v307_v57 = vmul.f32 %v1051_v14, %v219_v31  ;;  %v654_v3 = vld [vmem:[#allocation5 + $0x688] sm:$0xff]  ;;  %v438_v8 = vld [vmem:[#allocation5 + $0x490] sm:$0xff]  ;;  %v222_v31 = vld [vmem:[#allocation5 + $0x298] sm:$0xff] }
  0x37   :  { %v802_v62 = vadd.f32 %v738_v10, %v585_v36  ;;  %v586_v0 = vadd.f32 %v522_v22, %v369_v38  ;;  %v370_v61 = vadd.f32 %v306_v41, %v153_v9  ;;  %v524_v7 = vmul.f32 %v1053_v15, %v436_v33  ;;  %v655_v5 = vld [vmem:[#allocation5 + $0x690] sm:$0xff]  ;;  %v65_v22 = vld [vmem:[#allocation5 + $0x98] sm:$0xff] }
  0x38   :  { %865 = vst [vmem:[#allocation7 + $0x60] sm:$0xff] %v801_v39  ;;  %v741_v23 = vmul.f32 %v1055_v16, %v653_v49  ;;  %v155_v47 = vmul.f32 %v1057_v19, %v63_v44  ;;  %v308_v40 = vmul.f32 %v1059_v20, %v220_v50  ;;  %v371_v30 = vadd.f32 %v307_v57, %v154_v53  ;;  %v439_v41 = vld [vmem:[#allocation5 + $0x498] sm:$0xff]  ;;  %v66_v44 = vld [vmem:[#allocation5 + $0xa0] sm:$0xff] }
  0x39   :  { %866 = vst [vmem:[#allocation7 + $0x68] sm:$0xff] %v802_v62  ;;  %v803_v10 = vadd.f32 %v739_v29, %v586_v0  ;;  %v587_v25 = vadd.f32 %v523_v11, %v370_v61  ;;  %v525_v54 = vmul.f32 %v1061_v21, %v437_v34  ;;  %v742_v38 = vmul.f32 %v1070_v32, %v654_v3  ;;  %v656_v49 = vld [vmem:[#allocation5 + $0x698] sm:$0xff]  ;;  %v1381_v29 = vld [vmem:[#allocation11_spill] sm:$0xff] }
  0x3a   :  { %v372_v36 = vadd.f32 %v308_v40, %v155_v47  ;;  %v156_v33 = vmul.f32 %v1073_v45, %v64_v4  ;;  %v309_v9 = vmul.f32 %v1075_v46, %v221_v6  ;;  %v588_v39 = vadd.f32 %v524_v7, %v371_v30  ;;  %v223_v34 = vld [vmem:[#allocation5 + $0x2a0] sm:$0xff]  ;;  %v67_v6 = vld [vmem:[#allocation5 + $0xa8] sm:$0xff] }
  0x3b   :  { %867 = vst [vmem:[#allocation7 + $0x70] sm:$0xff] %v803_v10  ;;  %v804_v50 = vadd.f32 %v740_v37, %v587_v25  ;;  %v526_v11 = vmul.f32 %v1381_v29, %v438_v8  ;;  %v743_v53 = vmul.f32 %v1079_v51, %v655_v5  ;;  %v440_v62 = vld [vmem:[#allocation5 + $0x4a0] sm:$0xff]  ;;  %v157_v57 = vmul.f32 %v1081_v52, %v65_v22  ;;  %v224_v47 = vld [vmem:[#allocation5 + $0x2a8] sm:$0xff] }
  0x3c   :  { %v589_v0 = vadd.f32 %v525_v54, %v372_v36  ;;  %v373_v61 = vadd.f32 %v309_v9, %v156_v33  ;;  %v310_v3 = vmul.f32 %v1088_v63, %v222_v31  ;;  %v657_v4 = vld [vmem:[#allocation5 + $0x6a0] sm:$0xff]  ;;  %v805_v40 = vadd.f32 %v741_v23, %v588_v39  ;;  %v441_v5 = vld [vmem:[#allocation5 + $0x4a8] sm:$0xff]  ;;  %v68_v36 = vld [vmem:[#allocation5 + $0xb0] sm:$0xff] }
  0x3d   :  { %868 = vst [vmem:[#allocation7 + $0x78] sm:$0xff] %v804_v50  ;;  %v527_v37 = vmul.f32 %v1091_v12, %v439_v41  ;;  %v744_v7 = vmul.f32 %v1093_v17, %v656_v49  ;;  %v158_v8 = vmul.f32 %v1095_v18, %v66_v44  ;;  %v311_v54 = vmul.f32 %v1097_v26, %v223_v34  ;;  %v658_v22 = vld [vmem:[#allocation5 + $0x6a8] sm:$0xff]  ;;  %v225_v31 = vld [vmem:[#allocation5 + $0x2b0] sm:$0xff]  ;;  %v69_v34 = vld [vmem:[#allocation5 + $0xb8] sm:$0xff] }
  0x3e   :  { %v806_v10 = vadd.f32 %v742_v38, %v589_v0  ;;  %v590_v25 = vadd.f32 %v526_v11, %v373_v61  ;;  %v374_v30 = vadd.f32 %v310_v3, %v157_v57  ;;  %869 = vst [vmem:[#allocation7 + $0x80] sm:$0xff] %v805_v40  ;;  %v528_v33 = vmul.f32 %v1099_v27, %v440_v62  ;;  %v442_v49 = vld [vmem:[#allocation5 + $0x4b0] sm:$0xff]  ;;  %v226_v0 = vld [vmem:[#allocation5 + $0x2b8] sm:$0xff] }
  0x3f   :  { %v745_v23 = vmul.f32 %v1101_v28, %v657_v4  ;;  %v159_v9 = vmul.f32 %v1109_v48, %v67_v6  ;;  %v312_v41 = vmul.f32 %v1111_v58, %v224_v47  ;;  %v659_v44 = vld [vmem:[#allocation5 + $0x6b0] sm:$0xff]  ;;  %v375_v39 = vadd.f32 %v311_v54, %v158_v8  ;;  %v443_v4 = vld [vmem:[#allocation5 + $0x4b8] sm:$0xff]  ;;  %v70_v47 = vld [vmem:[#allocation5 + $0xc0] sm:$0xff] }
  0x40   :  { %870 = vst [vmem:[#allocation7 + $0x88] sm:$0xff] %v806_v10  ;;  %v807_v38 = vadd.f32 %v743_v53, %v590_v25  ;;  %v591_v50 = vadd.f32 %v527_v37, %v374_v30  ;;  %v529_v11 = vmul.f32 %v1113_v59, %v441_v5  ;;  %v746_v57 = vmul.f32 %v1115_v60, %v658_v22  ;;  %v660_v6 = vld [vmem:[#allocation5 + $0x6b8] sm:$0xff]  ;;  %v227_v8 = vld [vmem:[#allocation5 + $0x2c0] sm:$0xff] }
  0x41   :  { %v376_v61 = vadd.f32 %v312_v41, %v159_v9  ;;  %v160_v62 = vmul.f32 %v1118_v1, %v68_v36  ;;  %v313_v3 = vmul.f32 %v1120_v2, %v225_v31  ;;  %v592_v10 = vadd.f32 %v528_v33, %v375_v39  ;;  %v444_v5 = vld [vmem:[#allocation5 + $0x4c0] sm:$0xff]  ;;  %v71_v31 = vld [vmem:[#allocation5 + $0xc8] sm:$0xff] }
  0x42   :  { %871 = vst [vmem:[#allocation7 + $0x90] sm:$0xff] %v807_v38  ;;  %v808_v40 = vadd.f32 %v744_v7, %v591_v50  ;;  %v530_v53 = vmul.f32 %v1127_v24, %v442_v49  ;;  %v747_v37 = vmul.f32 %v1129_v35, %v659_v44  ;;  %v161_v54 = vmul.f32 %v1132_v42, %v69_v34  ;;  %v661_v36 = vld [vmem:[#allocation5 + $0x6c0] sm:$0xff]  ;;  %v228_v9 = vld [vmem:[#allocation5 + $0x2c8] sm:$0xff] }
  0x43   :  { %v593_v25 = vadd.f32 %v529_v11, %v376_v61  ;;  %v377_v30 = vadd.f32 %v313_v3, %v160_v62  ;;  %v314_v22 = vmul.f32 %v1134_v43, %v226_v0  ;;  %v809_v41 = vadd.f32 %v745_v23, %v592_v10  ;;  %v445_v44 = vld [vmem:[#allocation5 + $0x4c8] sm:$0xff]  ;;  %v72_v61 = vld [vmem:[#allocation5 + $0xd0] sm:$0xff] }
  0x44   :  { %872 = vst [vmem:[#allocation7 + $0x98] sm:$0xff] %v808_v40  ;;  %v531_v7 = vmul.f32 %v1137_v55, %v443_v4  ;;  %v748_v33 = vmul.f32 %v1139_v56, %v660_v6  ;;  %v162_v49 = vmul.f32 %v1049_v13, %v70_v47  ;;  %v315_v11 = vmul.f32 %v1051_v14, %v227_v8  ;;  %v662_v34 = vld [vmem:[#allocation5 + $0x6c8] sm:$0xff]  ;;  %v229_v0 = vld [vmem:[#allocation5 + $0x2d0] sm:$0xff]  ;;  %v73_v8 = vld [vmem:[#allocation5 + $0xd8] sm:$0xff] }
  0x45   :  { %v810_v38 = vadd.f32 %v746_v57, %v593_v25  ;;  %v594_v50 = vadd.f32 %v530_v53, %v377_v30  ;;  %v378_v39 = vadd.f32 %v314_v22, %v161_v54  ;;  %873 = vst [vmem:[#allocation7 + $0xa0] sm:$0xff] %v809_v41  ;;  %v532_v62 = vmul.f32 %v1053_v15, %v444_v5  ;;  %v446_v6 = vld [vmem:[#allocation5 + $0x4d0] sm:$0xff]  ;;  %v230_v25 = vld [vmem:[#allocation5 + $0x2d8] sm:$0xff] }
  0x46   :  { %v749_v23 = vmul.f32 %v1055_v16, %v661_v36  ;;  %v163_v3 = vmul.f32 %v1057_v19, %v71_v31  ;;  %v316_v4 = vmul.f32 %v1059_v20, %v228_v9  ;;  %v663_v47 = vld [vmem:[#allocation5 + $0x6d0] sm:$0xff]  ;;  %v379_v10 = vadd.f32 %v315_v11, %v162_v49  ;;  %v447_v36 = vld [vmem:[#allocation5 + $0x4d8] sm:$0xff]  ;;  %v74_v9 = vld [vmem:[#allocation5 + $0xe0] sm:$0xff] }
  0x47   :  { %874 = vst [vmem:[#allocation7 + $0xa8] sm:$0xff] %v810_v38  ;;  %v811_v57 = vadd.f32 %v747_v37, %v594_v50  ;;  %v595_v40 = vadd.f32 %v531_v7, %v378_v39  ;;  %v533_v53 = vmul.f32 %v1061_v21, %v445_v44  ;;  %v750_v54 = vmul.f32 %v1070_v32, %v662_v34  ;;  %v664_v31 = vld [vmem:[#allocation5 + $0x6d8] sm:$0xff]  ;;  %v231_v49 = vld [vmem:[#allocation5 + $0x2e0] sm:$0xff] }
  0x48   :  { %v380_v30 = vadd.f32 %v316_v4, %v163_v3  ;;  %v164_v5 = vmul.f32 %v1073_v45, %v72_v61  ;;  %v317_v22 = vmul.f32 %v1075_v46, %v229_v0  ;;  %v596_v38 = vadd.f32 %v532_v62, %v379_v10  ;;  %v448_v44 = vld [vmem:[#allocation5 + $0x4e0] sm:$0xff]  ;;  %v75_v0 = vld [vmem:[#allocation5 + $0xe8] sm:$0xff] }
  0x49   :  { %875 = vst [vmem:[#allocation7 + $0xb0] sm:$0xff] %v811_v57  ;;  %v812_v41 = vadd.f32 %v748_v33, %v595_v40  ;;  %v534_v37 = vmul.f32 %v1381_v29, %v446_v6  ;;  %v751_v7 = vmul.f32 %v1079_v51, %v663_v47  ;;  %v165_v11 = vmul.f32 %v1081_v52, %v73_v8  ;;  %v665_v61 = vld [vmem:[#allocation5 + $0x6e0] sm:$0xff]  ;;  %v232_v3 = vld [vmem:[#allocation5 + $0x2e8] sm:$0xff] }
  0x4a   :  { %v597_v50 = vadd.f32 %v533_v53, %v380_v30  ;;  %v381_v39 = vadd.f32 %v317_v22, %v164_v5  ;;  %v318_v34 = vmul.f32 %v1088_v63, %v230_v25  ;;  %v813_v4 = vadd.f32 %v749_v23, %v596_v38  ;;  %v449_v47 = vld [vmem:[#allocation5 + $0x4e8] sm:$0xff]  ;;  %v76_v30 = vld [vmem:[#allocation5 + $0xf0] sm:$0xff] }
  0x4b   :  { %876 = vst [vmem:[#allocation7 + $0xb8] sm:$0xff] %v812_v41  ;;  %v535_v33 = vmul.f32 %v1091_v12, %v447_v36  ;;  %v752_v62 = vmul.f32 %v1093_v17, %v664_v31  ;;  %v166_v6 = vmul.f32 %v1095_v18, %v74_v9  ;;  %v319_v53 = vmul.f32 %v1097_v26, %v231_v49  ;;  %v666_v8 = vld [vmem:[#allocation5 + $0x6e8] sm:$0xff]  ;;  %v233_v25 = vld [vmem:[#allocation5 + $0x2f0] sm:$0xff]  ;;  %v77_v49 = vld [vmem:[#allocation5 + $0xf8] sm:$0xff] }
  0x4c   :  { %v814_v57 = vadd.f32 %v750_v54, %v597_v50  ;;  %v598_v40 = vadd.f32 %v534_v37, %v381_v39  ;;  %v382_v10 = vadd.f32 %v318_v34, %v165_v11  ;;  %877 = vst [vmem:[#allocation7 + $0xc0] sm:$0xff] %v813_v4  ;;  %v536_v5 = vmul.f32 %v1099_v27, %v448_v44  ;;  %v450_v31 = vld [vmem:[#allocation5 + $0x4f0] sm:$0xff]  ;;  %v234_v50 = vld [vmem:[#allocation5 + $0x2f8] sm:$0xff] }
  0x4d   :  { %v753_v23 = vmul.f32 %v1101_v28, %v665_v61  ;;  %v167_v22 = vmul.f32 %v1109_v48, %v75_v0  ;;  %v320_v36 = vmul.f32 %v1111_v58, %v232_v3  ;;  %v667_v9 = vld [vmem:[#allocation5 + $0x6f0] sm:$0xff]  ;;  %v383_v38 = vadd.f32 %v319_v53, %v166_v6  ;;  %v451_v61 = vld [vmem:[#allocation5 + $0x4f8] sm:$0xff]  ;;  %v78_v3 = vld [vmem:[#allocation5 + $0x100] sm:$0xff] }
  0x4e   :  { %878 = vst [vmem:[#allocation7 + $0xc8] sm:$0xff] %v814_v57  ;;  %v815_v54 = vadd.f32 %v751_v7, %v598_v40  ;;  %v599_v41 = vadd.f32 %v535_v33, %v382_v10  ;;  %v537_v37 = vmul.f32 %v1113_v59, %v449_v47  ;;  %v754_v11 = vmul.f32 %v1115_v60, %v666_v8  ;;  %v668_v0 = vld [vmem:[#allocation5 + $0x6f8] sm:$0xff]  ;;  %v235_v6 = vld [vmem:[#allocation5 + $0x300] sm:$0xff] }
  0x4f   :  { %v384_v39 = vadd.f32 %v320_v36, %v167_v22  ;;  %v168_v44 = vmul.f32 %v1118_v1, %v76_v30  ;;  %v321_v34 = vmul.f32 %v1120_v2, %v233_v25  ;;  %v600_v57 = vadd.f32 %v536_v5, %v383_v38  ;;  %v452_v47 = vld [vmem:[#allocation5 + $0x500] sm:$0xff]  ;;  %v79_v25 = vld [vmem:[#allocation5 + $0x108] sm:$0xff] }
  0x50   :  { %879 = vst [vmem:[#allocation7 + $0xd0] sm:$0xff] %v815_v54  ;;  %v816_v4 = vadd.f32 %v752_v62, %v599_v41  ;;  %v538_v7 = vmul.f32 %v1127_v24, %v450_v31  ;;  %v755_v33 = vmul.f32 %v1129_v35, %v667_v9  ;;  %v169_v53 = vmul.f32 %v1132_v42, %v77_v49  ;;  %v669_v30 = vld [vmem:[#allocation5 + $0x700] sm:$0xff]  ;;  %v236_v22 = vld [vmem:[#allocation5 + $0x308] sm:$0xff] }
  0x51   :  { %v601_v40 = vadd.f32 %v537_v37, %v384_v39  ;;  %v385_v10 = vadd.f32 %v321_v34, %v168_v44  ;;  %v322_v8 = vmul.f32 %v1134_v43, %v234_v50  ;;  %v817_v36 = vadd.f32 %v753_v23, %v600_v57  ;;  %v453_v9 = vld [vmem:[#allocation5 + $0x508] sm:$0xff]  ;;  %v80_v39 = vld [vmem:[#allocation5 + $0x110] sm:$0xff] }
  0x52   :  { %880 = vst [vmem:[#allocation7 + $0xd8] sm:$0xff] %v816_v4  ;;  %v539_v62 = vmul.f32 %v1137_v55, %v451_v61  ;;  %v756_v5 = vmul.f32 %v1139_v56, %v668_v0  ;;  %v170_v31 = vmul.f32 %v1049_v13, %v78_v3  ;;  %v323_v37 = vmul.f32 %v1051_v14, %v235_v6  ;;  %v670_v49 = vld [vmem:[#allocation5 + $0x708] sm:$0xff]  ;;  %v237_v50 = vld [vmem:[#allocation5 + $0x310] sm:$0xff]  ;;  %v81_v6 = vld [vmem:[#allocation5 + $0x118] sm:$0xff] }
  0x53   :  { %v818_v54 = vadd.f32 %v754_v11, %v601_v40  ;;  %v602_v41 = vadd.f32 %v538_v7, %v385_v10  ;;  %v386_v38 = vadd.f32 %v322_v8, %v169_v53  ;;  %881 = vst [vmem:[#allocation7 + $0xe0] sm:$0xff] %v817_v36  ;;  %v540_v44 = vmul.f32 %v1053_v15, %v452_v47  ;;  %v454_v0 = vld [vmem:[#allocation5 + $0x510] sm:$0xff]  ;;  %v238_v40 = vld [vmem:[#allocation5 + $0x318] sm:$0xff] }
  0x54   :  { %v757_v23 = vmul.f32 %v1055_v16, %v669_v30  ;;  %v171_v34 = vmul.f32 %v1057_v19, %v79_v25  ;;  %v324_v61 = vmul.f32 %v1059_v20, %v236_v22  ;;  %v671_v3 = vld [vmem:[#allocation5 + $0x710] sm:$0xff]  ;;  %v387_v57 = vadd.f32 %v323_v37, %v170_v31  ;;  %v455_v30 = vld [vmem:[#allocation5 + $0x518] sm:$0xff]  ;;  %v82_v22 = vld [vmem:[#allocation5 + $0x120] sm:$0xff] }
  0x55   :  { %882 = vst [vmem:[#allocation7 + $0xe8] sm:$0xff] %v818_v54  ;;  %v819_v11 = vadd.f32 %v755_v33, %v602_v41  ;;  %v603_v4 = vadd.f32 %v539_v62, %v386_v38  ;;  %v541_v7 = vmul.f32 %v1061_v21, %v453_v9  ;;  %v758_v53 = vmul.f32 %v1070_v32, %v670_v49  ;;  %v672_v25 = vld [vmem:[#allocation5 + $0x718] sm:$0xff]  ;;  %v239_v31 = vld [vmem:[#allocation5 + $0x320] sm:$0xff] }
  0x56   :  { %v388_v10 = vadd.f32 %v324_v61, %v171_v34  ;;  %v172_v47 = vmul.f32 %v1073_v45, %v80_v39  ;;  %v325_v8 = vmul.f32 %v1075_v46, %v237_v50  ;;  %v604_v54 = vadd.f32 %v540_v44, %v387_v57  ;;  %v456_v9 = vld [vmem:[#allocation5 + $0x520] sm:$0xff]  ;;  %v83_v50 = vld [vmem:[#allocation5 + $0x128] sm:$0xff] }
  0x57   :  { %883 = vst [vmem:[#allocation7 + $0xf0] sm:$0xff] %v819_v11  ;;  %v820_v36 = vadd.f32 %v756_v5, %v603_v4  ;;  %v542_v33 = vmul.f32 %v1381_v29, %v454_v0  ;;  %v759_v62 = vmul.f32 %v1079_v51, %v671_v3  ;;  %v173_v37 = vmul.f32 %v1081_v52, %v81_v6  ;;  %v673_v39 = vld [vmem:[#allocation5 + $0x720] sm:$0xff]  ;;  %v240_v34 = vld [vmem:[#allocation5 + $0x328] sm:$0xff] }
  0x58   :  { %v605_v41 = vadd.f32 %v541_v7, %v388_v10  ;;  %v389_v38 = vadd.f32 %v325_v8, %v172_v47  ;;  %v326_v49 = vmul.f32 %v1088_v63, %v238_v40  ;;  %v821_v61 = vadd.f32 %v757_v23, %v604_v54  ;;  %v457_v3 = vld [vmem:[#allocation5 + $0x528] sm:$0xff]  ;;  %v84_v10 = vld [vmem:[#allocation5 + $0x130] sm:$0xff] }
  0x59   :  { %884 = vst [vmem:[#allocation7 + $0xf8] sm:$0xff] %v820_v36  ;;  %v543_v5 = vmul.f32 %v1091_v12, %v455_v30  ;;  %v760_v44 = vmul.f32 %v1093_v17, %v672_v25  ;;  %v174_v0 = vmul.f32 %v1095_v18, %v82_v22  ;;  %v327_v7 = vmul.f32 %v1097_v26, %v239_v31  ;;  %v674_v6 = vld [vmem:[#allocation5 + $0x728] sm:$0xff]  ;;  %v241_v40 = vld [vmem:[#allocation5 + $0x330] sm:$0xff]  ;;  %v85_v31 = vld [vmem:[#allocation5 + $0x138] sm:$0xff] }
  0x5a   :  { %v822_v11 = vadd.f32 %v758_v53, %v605_v41  ;;  %v606_v4 = vadd.f32 %v542_v33, %v389_v38  ;;  %v390_v57 = vadd.f32 %v326_v49, %v173_v37  ;;  %885 = vst [vmem:[#allocation7 + $0x100] sm:$0xff] %v821_v61  ;;  %v544_v47 = vmul.f32 %v1099_v27, %v456_v9  ;;  %v458_v25 = vld [vmem:[#allocation5 + $0x530] sm:$0xff]  ;;  %v242_v41 = vld [vmem:[#allocation5 + $0x338] sm:$0xff] }
  0x5b   :  { %v761_v23 = vmul.f32 %v1101_v28, %v673_v39  ;;  %v175_v8 = vmul.f32 %v1109_v48, %v83_v50  ;;  %v328_v30 = vmul.f32 %v1111_v58, %v240_v34  ;;  %v675_v22 = vld [vmem:[#allocation5 + $0x730] sm:$0xff]  ;;  %v391_v54 = vadd.f32 %v327_v7, %v174_v0  ;;  %v459_v39 = vld [vmem:[#allocation5 + $0x538] sm:$0xff]  ;;  %v86_v34 = vld [vmem:[#allocation5 + $0x140] sm:$0xff] }
  0x5c   :  { %886 = vst [vmem:[#allocation7 + $0x108] sm:$0xff] %v822_v11  ;;  %v823_v53 = vadd.f32 %v759_v62, %v606_v4  ;;  %v607_v36 = vadd.f32 %v543_v5, %v390_v57  ;;  %v545_v33 = vmul.f32 %v1113_v59, %v457_v3  ;;  %v762_v37 = vmul.f32 %v1115_v60, %v674_v6  ;;  %v676_v50 = vld [vmem:[#allocation5 + $0x738] sm:$0xff]  ;;  %v243_v0 = vld [vmem:[#allocation5 + $0x340] sm:$0xff] }
  0x5d   :  { %v392_v38 = vadd.f32 %v328_v30, %v175_v8  ;;  %v176_v9 = vmul.f32 %v1118_v1, %v84_v10  ;;  %v329_v49 = vmul.f32 %v1120_v2, %v241_v40  ;;  %v608_v11 = vadd.f32 %v544_v47, %v391_v54  ;;  %v460_v3 = vld [vmem:[#allocation5 + $0x540] sm:$0xff]  ;;  %v87_v40 = vld [vmem:[#allocation5 + $0x148] sm:$0xff] }
  0x5e   :  { %887 = vst [vmem:[#allocation7 + $0x110] sm:$0xff] %v823_v53  ;;  %v824_v61 = vadd.f32 %v760_v44, %v607_v36  ;;  %v546_v62 = vmul.f32 %v1127_v24, %v458_v25  ;;  %v763_v5 = vmul.f32 %v1129_v35, %v675_v22  ;;  %v177_v7 = vmul.f32 %v1132_v42, %v85_v31  ;;  %v677_v10 = vld [vmem:[#allocation5 + $0x740] sm:$0xff]  ;;  %v244_v8 = vld [vmem:[#allocation5 + $0x348] sm:$0xff] }
  0x5f   :  { %v609_v4 = vadd.f32 %v545_v33, %v392_v38  ;;  %v393_v57 = vadd.f32 %v329_v49, %v176_v9  ;;  %v330_v6 = vmul.f32 %v1134_v43, %v242_v41  ;;  %v825_v30 = vadd.f32 %v761_v23, %v608_v11  ;;  %v461_v22 = vld [vmem:[#allocation5 + $0x548] sm:$0xff]  ;;  %v88_v38 = vld [vmem:[#allocation5 + $0x150] sm:$0xff] }
  0x60   :  { %888 = vst [vmem:[#allocation7 + $0x118] sm:$0xff] %v824_v61  ;;  %v547_v44 = vmul.f32 %v1137_v55, %v459_v39  ;;  %v764_v47 = vmul.f32 %v1139_v56, %v676_v50  ;;  %v178_v25 = vmul.f32 %v1049_v13, %v86_v34  ;;  %v331_v33 = vmul.f32 %v1051_v14, %v243_v0  ;;  %v678_v31 = vld [vmem:[#allocation5 + $0x748] sm:$0xff]  ;;  %v245_v41 = vld [vmem:[#allocation5 + $0x350] sm:$0xff]  ;;  %v89_v0 = vld [vmem:[#allocation5 + $0x158] sm:$0xff] }
  0x61   :  { %v826_v53 = vadd.f32 %v762_v37, %v609_v4  ;;  %v610_v36 = vadd.f32 %v546_v62, %v393_v57  ;;  %v394_v54 = vadd.f32 %v330_v6, %v177_v7  ;;  %889 = vst [vmem:[#allocation7 + $0x120] sm:$0xff] %v825_v30  ;;  %v548_v9 = vmul.f32 %v1053_v15, %v460_v3  ;;  %v462_v50 = vld [vmem:[#allocation5 + $0x550] sm:$0xff]  ;;  %v246_v4 = vld [vmem:[#allocation5 + $0x358] sm:$0xff] }
  0x62   :  { %v765_v23 = vmul.f32 %v1055_v16, %v677_v10  ;;  %v179_v49 = vmul.f32 %v1057_v19, %v87_v40  ;;  %v332_v39 = vmul.f32 %v1059_v20, %v244_v8  ;;  %v679_v34 = vld [vmem:[#allocation5 + $0x750] sm:$0xff]  ;;  %v395_v11 = vadd.f32 %v331_v33, %v178_v25  ;;  %v463_v10 = vld [vmem:[#allocation5 + $0x558] sm:$0xff]  ;;  %v90_v8 = vld [vmem:[#allocation5 + $0x160] sm:$0xff] }
  0x63   :  { %890 = vst [vmem:[#allocation7 + $0x128] sm:$0xff] %v826_v53  ;;  %v827_v37 = vadd.f32 %v763_v5, %v610_v36  ;;  %v611_v61 = vadd.f32 %v547_v44, %v394_v54  ;;  %v549_v62 = vmul.f32 %v1061_v21, %v461_v22  ;;  %v766_v7 = vmul.f32 %v1070_v32, %v678_v31  ;;  %v680_v40 = vld [vmem:[#allocation5 + $0x758] sm:$0xff]  ;;  %v247_v25 = vld [vmem:[#allocation5 + $0x360] sm:$0xff] }
  0x64   :  { %v396_v57 = vadd.f32 %v332_v39, %v179_v49  ;;  %v180_v3 = vmul.f32 %v1073_v45, %v88_v38  ;;  %v333_v6 = vmul.f32 %v1075_v46, %v245_v41  ;;  %v612_v53 = vadd.f32 %v548_v9, %v395_v11  ;;  %v464_v22 = vld [vmem:[#allocation5 + $0x560] sm:$0xff]  ;;  %v91_v41 = vld [vmem:[#allocation5 + $0x168] sm:$0xff] }
  0x65   :  { %891 = vst [vmem:[#allocation7 + $0x130] sm:$0xff] %v827_v37  ;;  %v828_v30 = vadd.f32 %v764_v47, %v611_v61  ;;  %v550_v5 = vmul.f32 %v1381_v29, %v462_v50  ;;  %v767_v44 = vmul.f32 %v1079_v51, %v679_v34  ;;  %v181_v33 = vmul.f32 %v1081_v52, %v89_v0  ;;  %v681_v38 = vld [vmem:[#allocation5 + $0x760] sm:$0xff]  ;;  %v248_v49 = vld [vmem:[#allocation5 + $0x368] sm:$0xff] }
  0x66   :  { %v613_v36 = vadd.f32 %v549_v62, %v396_v57  ;;  %v397_v54 = vadd.f32 %v333_v6, %v180_v3  ;;  %v334_v31 = vmul.f32 %v1088_v63, %v246_v4  ;;  %v829_v39 = vadd.f32 %v765_v23, %v612_v53  ;;  %v465_v34 = vld [vmem:[#allocation5 + $0x568] sm:$0xff]  ;;  %v92_v57 = vld [vmem:[#allocation5 + $0x170] sm:$0xff] }
  0x67   :  { %892 = vst [vmem:[#allocation7 + $0x138] sm:$0xff] %v828_v30  ;;  %v551_v47 = vmul.f32 %v1091_v12, %v463_v10  ;;  %v768_v9 = vmul.f32 %v1093_v17, %v680_v40  ;;  %v182_v50 = vmul.f32 %v1095_v18, %v90_v8  ;;  %v335_v62 = vmul.f32 %v1097_v26, %v247_v25  ;;  %v682_v0 = vld [vmem:[#allocation5 + $0x768] sm:$0xff]  ;;  %v249_v4 = vld [vmem:[#allocation5 + $0x370] sm:$0xff]  ;;  %v93_v25 = vld [vmem:[#allocation5 + $0x178] sm:$0xff] }
  0x68   :  { %v830_v37 = vadd.f32 %v766_v7, %v613_v36  ;;  %v614_v61 = vadd.f32 %v550_v5, %v397_v54  ;;  %v398_v11 = vadd.f32 %v334_v31, %v181_v33  ;;  %893 = vst [vmem:[#allocation7 + $0x140] sm:$0xff] %v829_v39  ;;  %v552_v3 = vmul.f32 %v1099_v27, %v464_v22  ;;  %v466_v40 = vld [vmem:[#allocation5 + $0x570] sm:$0xff]  ;;  %v250_v36 = vld [vmem:[#allocation5 + $0x378] sm:$0xff] }
  0x69   :  { %v769_v23 = vmul.f32 %v1101_v28, %v681_v38  ;;  %v183_v6 = vmul.f32 %v1109_v48, %v91_v41  ;;  %v336_v10 = vmul.f32 %v1111_v58, %v248_v49  ;;  %v683_v8 = vld [vmem:[#allocation5 + $0x770] sm:$0xff]  ;;  %v399_v53 = vadd.f32 %v335_v62, %v182_v50  ;;  %v467_v38 = vld [vmem:[#allocation5 + $0x578] sm:$0xff]  ;;  %v94_v49 = vld [vmem:[#allocation5 + $0x180] sm:$0xff] }
  0x6a   :  { %894 = vst [vmem:[#allocation7 + $0x148] sm:$0xff] %v830_v37  ;;  %v831_v7 = vadd.f32 %v767_v44, %v614_v61  ;;  %v615_v30 = vadd.f32 %v551_v47, %v398_v11  ;;  %v553_v5 = vmul.f32 %v1113_v59, %v465_v34  ;;  %v770_v33 = vmul.f32 %v1115_v60, %v682_v0  ;;  %v684_v41 = vld [vmem:[#allocation5 + $0x778] sm:$0xff]  ;;  %v251_v50 = vld [vmem:[#allocation5 + $0x380] sm:$0xff]  ;;  %v95_v34 = vld [vmem:[#allocation5 + $0x188] sm:$0xff] }
  0x6b   :  { %v400_v54 = vadd.f32 %v336_v10, %v183_v6  ;;  %v184_v22 = vmul.f32 %v1118_v1, %v92_v57  ;;  %v337_v31 = vmul.f32 %v1120_v2, %v249_v4  ;;  %v616_v37 = vadd.f32 %v552_v3, %v399_v53  ;;  %v468_v57 = vld [vmem:[#allocation5 + $0x580] sm:$0xff]  ;;  %v252_v6 = vld [vmem:[#allocation5 + $0x388] sm:$0xff] }
  0x6c   :  { %895 = vst [vmem:[#allocation7 + $0x150] sm:$0xff] %v831_v7  ;;  %v832_v39 = vadd.f32 %v768_v9, %v615_v30  ;;  %v554_v44 = vmul.f32 %v1127_v24, %v466_v40  ;;  %v771_v47 = vmul.f32 %v1129_v35, %v683_v8  ;;  %v185_v62 = vmul.f32 %v1132_v42, %v93_v25  ;;  %v685_v4 = vld [vmem:[#allocation5 + $0x780] sm:$0xff]  ;;  %v469_v8 = vld [vmem:[#allocation5 + $0x588] sm:$0xff] }
  0x6d   :  { %v617_v61 = vadd.f32 %v553_v5, %v400_v54  ;;  %v401_v11 = vadd.f32 %v337_v31, %v184_v22  ;;  %v338_v0 = vmul.f32 %v1134_v43, %v250_v36  ;;  %v833_v10 = vadd.f32 %v769_v23, %v616_v37  ;;  %v686_v25 = vld [vmem:[#allocation5 + $0x788] sm:$0xff]  ;;  %v96_v54 = vld [vmem:[#allocation5 + $0x190] sm:$0xff] }
  0x6e   :  { %896 = vst [vmem:[#allocation7 + $0x158] sm:$0xff] %v832_v39  ;;  %v555_v9 = vmul.f32 %v1137_v55, %v467_v38  ;;  %v772_v3 = vmul.f32 %v1139_v56, %v684_v41  ;;  %v186_v40 = vmul.f32 %v1049_v13, %v94_v49  ;;  %v339_v5 = vmul.f32 %v1051_v14, %v251_v50  ;;  %v253_v36 = vld [vmem:[#allocation5 + $0x390] sm:$0xff]  ;;  %v97_v50 = vld [vmem:[#allocation5 + $0x198] sm:$0xff] }
  0x6f   :  { %v834_v7 = vadd.f32 %v770_v33, %v617_v61  ;;  %v618_v30 = vadd.f32 %v554_v44, %v401_v11  ;;  %v402_v53 = vadd.f32 %v338_v0, %v185_v62  ;;  %897 = vst [vmem:[#allocation7 + $0x160] sm:$0xff] %v833_v10  ;;  %v556_v22 = vmul.f32 %v1053_v15, %v468_v57  ;;  %v470_v41 = vld [vmem:[#allocation5 + $0x590] sm:$0xff]  ;;  %v254_v61 = vld [vmem:[#allocation5 + $0x398] sm:$0xff] }
  0x70   :  { %v773_v23 = vmul.f32 %v1055_v16, %v685_v4  ;;  %v187_v31 = vmul.f32 %v1057_v19, %v95_v34  ;;  %v340_v38 = vmul.f32 %v1059_v20, %v252_v6  ;;  %v687_v49 = vld [vmem:[#allocation5 + $0x790] sm:$0xff]  ;;  %v403_v37 = vadd.f32 %v339_v5, %v186_v40  ;;  %v471_v34 = vld [vmem:[#allocation5 + $0x598] sm:$0xff]  ;;  %v98_v6 = vld [vmem:[#allocation5 + $0x1a0] sm:$0xff] }
  0x71   :  { %898 = vst [vmem:[#allocation7 + $0x168] sm:$0xff] %v834_v7  ;;  %v835_v33 = vadd.f32 %v771_v47, %v618_v30  ;;  %v619_v39 = vadd.f32 %v555_v9, %v402_v53  ;;  %v557_v44 = vmul.f32 %v1061_v21, %v469_v8  ;;  %v774_v62 = vmul.f32 %v1070_v32, %v686_v25  ;;  %v688_v4 = vld [vmem:[#allocation5 + $0x798] sm:$0xff]  ;;  %v255_v40 = vld [vmem:[#allocation5 + $0x3a0] sm:$0xff]  ;;  %v99_v8 = vld [vmem:[#allocation5 + $0x1a8] sm:$0xff] }
  0x72   :  { %v404_v11 = vadd.f32 %v340_v38, %v187_v31  ;;  %v188_v0 = vmul.f32 %v1073_v45, %v96_v54  ;;  %v341_v57 = vmul.f32 %v1075_v46, %v253_v36  ;;  %v620_v7 = vadd.f32 %v556_v22, %v403_v37  ;;  %v472_v54 = vld [vmem:[#allocation5 + $0x5a0] sm:$0xff]  ;;  %v256_v31 = vld [vmem:[#allocation5 + $0x3a8] sm:$0xff] }
  0x73   :  { %899 = vst [vmem:[#allocation7 + $0x170] sm:$0xff] %v835_v33  ;;  %v836_v10 = vadd.f32 %v772_v3, %v619_v39  ;;  %v558_v47 = vmul.f32 %v1381_v29, %v470_v41  ;;  %v775_v9 = vmul.f32 %v1079_v51, %v687_v49  ;;  %v189_v5 = vmul.f32 %v1081_v52, %v97_v50  ;;  %v689_v36 = vld [vmem:[#allocation5 + $0x7a0] sm:$0xff]  ;;  %v473_v49 = vld [vmem:[#allocation5 + $0x5a8] sm:$0xff] }
  0x74   :  { %v621_v30 = vadd.f32 %v557_v44, %v404_v11  ;;  %v405_v53 = vadd.f32 %v341_v57, %v188_v0  ;;  %v342_v25 = vmul.f32 %v1088_v63, %v254_v61  ;;  %v837_v38 = vadd.f32 %v773_v23, %v620_v7  ;;  %v690_v50 = vld [vmem:[#allocation5 + $0x7a8] sm:$0xff]  ;;  %v100_v11 = vld [vmem:[#allocation5 + $0x1b0] sm:$0xff] }
  0x75   :  { %900 = vst [vmem:[#allocation7 + $0x178] sm:$0xff] %v836_v10  ;;  %v559_v3 = vmul.f32 %v1091_v12, %v471_v34  ;;  %v776_v22 = vmul.f32 %v1093_v17, %v688_v4  ;;  %v190_v41 = vmul.f32 %v1095_v18, %v98_v6  ;;  %v343_v44 = vmul.f32 %v1097_v26, %v255_v40  ;;  %v257_v61 = vld [vmem:[#allocation5 + $0x3b0] sm:$0xff]  ;;  %v101_v40 = vld [vmem:[#allocation5 + $0x1b8] sm:$0xff] }
  0x76   :  { %v838_v33 = vadd.f32 %v774_v62, %v621_v30  ;;  %v622_v39 = vadd.f32 %v558_v47, %v405_v53  ;;  %v406_v37 = vadd.f32 %v342_v25, %v189_v5  ;;  %901 = vst [vmem:[#allocation7 + $0x180] sm:$0xff] %v837_v38  ;;  %v560_v0 = vmul.f32 %v1099_v27, %v472_v54  ;;  %v474_v4 = vld [vmem:[#allocation5 + $0x5b0] sm:$0xff]  ;;  %v258_v30 = vld [vmem:[#allocation5 + $0x3b8] sm:$0xff] }
  0x77   :  { %v777_v23 = vmul.f32 %v1101_v28, %v689_v36  ;;  %v191_v57 = vmul.f32 %v1109_v48, %v99_v8  ;;  %v344_v34 = vmul.f32 %v1111_v58, %v256_v31  ;;  %v691_v6 = vld [vmem:[#allocation5 + $0x7b0] sm:$0xff]  ;;  %v407_v7 = vadd.f32 %v343_v44, %v190_v41  ;;  %v475_v8 = vld [vmem:[#allocation5 + $0x5b8] sm:$0xff]  ;;  %v102_v31 = vld [vmem:[#allocation5 + $0x1c0] sm:$0xff] }
  0x78   :  { %902 = vst [vmem:[#allocation7 + $0x188] sm:$0xff] %v838_v33  ;;  %v839_v62 = vadd.f32 %v775_v9, %v622_v39  ;;  %v623_v10 = vadd.f32 %v559_v3, %v406_v37  ;;  %v561_v47 = vmul.f32 %v1113_v59, %v473_v49  ;;  %v778_v5 = vmul.f32 %v1115_v60, %v690_v50  ;;  %v692_v36 = vld [vmem:[#allocation5 + $0x7b8] sm:$0xff]  ;;  %v259_v41 = vld [vmem:[#allocation5 + $0x3c0] sm:$0xff]  ;;  %v103_v49 = vld [vmem:[#allocation5 + $0x1c8] sm:$0xff] }
  0x79   :  { %v408_v53 = vadd.f32 %v344_v34, %v191_v57  ;;  %v192_v25 = vmul.f32 %v1118_v1, %v100_v11  ;;  %v345_v54 = vmul.f32 %v1120_v2, %v257_v61  ;;  %v624_v33 = vadd.f32 %v560_v0, %v407_v7  ;;  %v476_v11 = vld [vmem:[#allocation5 + $0x5c0] sm:$0xff]  ;;  %v260_v57 = vld [vmem:[#allocation5 + $0x3c8] sm:$0xff] }
  0x7a   :  { %903 = vst [vmem:[#allocation7 + $0x190] sm:$0xff] %v839_v62  ;;  %v840_v38 = vadd.f32 %v776_v22, %v623_v10  ;;  %v562_v9 = vmul.f32 %v1127_v24, %v474_v4  ;;  %v779_v3 = vmul.f32 %v1129_v35, %v691_v6  ;;  %v193_v44 = vmul.f32 %v1132_v42, %v101_v40  ;;  %v693_v61 = vld [vmem:[#allocation5 + $0x7c0] sm:$0xff]  ;;  %v477_v6 = vld [vmem:[#allocation5 + $0x5c8] sm:$0xff] }
  0x7b   :  { %v625_v39 = vadd.f32 %v561_v47, %v408_v53  ;;  %v409_v37 = vadd.f32 %v345_v54, %v192_v25  ;;  %v346_v50 = vmul.f32 %v1134_v43, %v258_v30  ;;  %v841_v34 = vadd.f32 %v777_v23, %v624_v33  ;;  %v694_v40 = vld [vmem:[#allocation5 + $0x7c8] sm:$0xff]  ;;  %v104_v53 = vld [vmem:[#allocation5 + $0x1d0] sm:$0xff]  ;;  %v105_v33 = vld [vmem:[#allocation5 + $0x1d8] sm:$0xff] }
  0x7c   :  { %904 = vst [vmem:[#allocation7 + $0x198] sm:$0xff] %v840_v38  ;;  %v563_v22 = vmul.f32 %v1137_v55, %v475_v8  ;;  %v780_v0 = vmul.f32 %v1139_v56, %v692_v36  ;;  %v194_v4 = vmul.f32 %v1049_v13, %v102_v31  ;;  %v347_v47 = vmul.f32 %v1051_v14, %v259_v41  ;;  %v261_v30 = vld [vmem:[#allocation5 + $0x3d0] sm:$0xff] }
  0x7d   :  { %v842_v62 = vadd.f32 %v778_v5, %v625_v39  ;;  %v626_v10 = vadd.f32 %v562_v9, %v409_v37  ;;  %v410_v7 = vadd.f32 %v346_v50, %v193_v44  ;;  %905 = vst [vmem:[#allocation7 + $0x1a0] sm:$0xff] %v841_v34  ;;  %v564_v25 = vmul.f32 %v1053_v15, %v476_v11  ;;  %v478_v36 = vld [vmem:[#allocation5 + $0x5d0] sm:$0xff]  ;;  %v262_v9 = vld [vmem:[#allocation5 + $0x3d8] sm:$0xff]  ;;  %v107_v11 = vld [vmem:[#allocation5 + $0x1e8] sm:$0xff] }
  0x7e   :  { %v781_v23 = vmul.f32 %v1055_v16, %v693_v61  ;;  %v195_v54 = vmul.f32 %v1057_v19, %v103_v49  ;;  %v348_v8 = vmul.f32 %v1059_v20, %v260_v57  ;;  %v695_v13 = vld [vmem:[#allocation5 + $0x7d0] sm:$0xff]  ;;  %v411_v38 = vadd.f32 %v347_v47, %v194_v4  ;;  %v479_v19 = vld [vmem:[#allocation5 + $0x5d8] sm:$0xff]  ;;  %v106_v20 = vld [vmem:[#allocation5 + $0x1e0] sm:$0xff] }
  0x7f   :  { %906 = vst [vmem:[#allocation7 + $0x1a8] sm:$0xff] %v842_v62  ;;  %v843_v5 = vadd.f32 %v779_v3, %v626_v10  ;;  %v627_v31 = vadd.f32 %v563_v22, %v410_v7  ;;  %v565_v14 = vmul.f32 %v1061_v21, %v477_v6  ;;  %v782_v39 = vmul.f32 %v1070_v32, %v694_v40  ;;  %v696_v49 = vld [vmem:[#allocation5 + $0x7d8] sm:$0xff]  ;;  %v263_v21 = vld [vmem:[#allocation5 + $0x3e0] sm:$0xff]  ;;  %v264_v22 = vld [vmem:[#allocation5 + $0x3e8] sm:$0xff] }
  0x80   :  { %v412_v41 = vadd.f32 %v348_v8, %v195_v54  ;;  %v196_v15 = vmul.f32 %v1073_v45, %v104_v53  ;;  %v349_v16 = vmul.f32 %v1075_v46, %v261_v30  ;;  %v628_v44 = vadd.f32 %v564_v25, %v411_v38  ;;  %v480_v34 = vld [vmem:[#allocation5 + $0x5e0] sm:$0xff]  ;;  %v108_v40 = vld [vmem:[#allocation5 + $0x1f0] sm:$0xff] }
  0x81   :  { %907 = vst [vmem:[#allocation7 + $0x1b0] sm:$0xff] %v843_v5  ;;  %v844_v37 = vadd.f32 %v780_v0, %v627_v31  ;;  %v566_v3 = vmul.f32 %v1381_v29, %v478_v36  ;;  %v783_v50 = vmul.f32 %v1079_v51, %v695_v13  ;;  %v197_v32 = vmul.f32 %v1081_v52, %v105_v33  ;;  %v697_v46 = vld [vmem:[#allocation5 + $0x7e0] sm:$0xff]  ;;  %v481_v51 = vld [vmem:[#allocation5 + $0x5e8] sm:$0xff]  ;;  %v482_v25 = vld [vmem:[#allocation5 + $0x5f0] sm:$0xff] }
  0x82   :  { %v629_v61 = vadd.f32 %v565_v14, %v412_v41  ;;  %v413_v57 = vadd.f32 %v349_v16, %v196_v15  ;;  %v350_v45 = vmul.f32 %v1088_v63, %v262_v9  ;;  %v845_v4 = vadd.f32 %v781_v23, %v628_v44  ;;  %v698_v52 = vld [vmem:[#allocation5 + $0x7e8] sm:$0xff]  ;;  %v265_v63 = vld [vmem:[#allocation5 + $0x3f0] sm:$0xff]  ;;  %v109_v36 = vld [vmem:[#allocation5 + $0x1f8] sm:$0xff] }
  0x83   :  { %908 = vst [vmem:[#allocation7 + $0x1b8] sm:$0xff] %v844_v37  ;;  %v567_v0 = vmul.f32 %v1091_v12, %v479_v19  ;;  %v784_v6 = vmul.f32 %v1093_v17, %v696_v49  ;;  %v198_v29 = vmul.f32 %v1095_v18, %v106_v20  ;;  %v351_v47 = vmul.f32 %v1097_v26, %v263_v21  ;;  %v699_v18 = vld [vmem:[#allocation5 + $0x7f0] sm:$0xff]  ;;  %v266_v13 = vld [vmem:[#allocation5 + $0x3f8] sm:$0xff] }
  0x84   :  { %v846_v62 = vadd.f32 %v782_v39, %v629_v61  ;;  %v630_v10 = vadd.f32 %v566_v3, %v413_v57  ;;  %v414_v7 = vadd.f32 %v350_v45, %v197_v32  ;;  %909 = vst [vmem:[#allocation7 + $0x1c0] sm:$0xff] %v845_v4  ;;  %v568_v53 = vmul.f32 %v1099_v27, %v480_v34  ;;  %v700_v9 = vld [vmem:[#allocation5 + $0x7f8] sm:$0xff] }
  0x85   :  { %v785_v30 = vmul.f32 %v1101_v28, %v697_v46  ;;  %v199_v12 = vmul.f32 %v1109_v48, %v107_v11  ;;  %v352_v17 = vmul.f32 %v1111_v58, %v264_v22  ;;  %v415_v8 = vadd.f32 %v351_v47, %v198_v29  ;;  %v483_v48 = vld [vmem:[#allocation5 + $0x5f8] sm:$0xff] }
  0x86   :  { %910 = vst [vmem:[#allocation7 + $0x1c8] sm:$0xff] %v846_v62  ;;  %v847_v23 = vadd.f32 %v783_v50, %v630_v10  ;;  %v631_v54 = vadd.f32 %v567_v0, %v414_v7  ;;  %v569_v26 = vmul.f32 %v1113_v59, %v481_v51  ;;  %v786_v31 = vmul.f32 %v1115_v60, %v698_v52 }
  0x87   :  { %v416_v5 = vadd.f32 %v352_v17, %v199_v12  ;;  %v200_v27 = vmul.f32 %v1118_v1, %v108_v40  ;;  %v353_v28 = vmul.f32 %v1120_v2, %v265_v63  ;;  %v632_v38 = vadd.f32 %v568_v53, %v415_v8 }
  0x88   :  { %911 = vst [vmem:[#allocation7 + $0x1d0] sm:$0xff] %v847_v23  ;;  %v848_v58 = vadd.f32 %v784_v6, %v631_v54  ;;  %v570_v14 = vmul.f32 %v1127_v24, %v482_v25  ;;  %v787_v33 = vmul.f32 %v1129_v35, %v699_v18  ;;  %v201_v39 = vmul.f32 %v1132_v42, %v109_v36 }
  0x89   :  { %v633_v41 = vadd.f32 %v569_v26, %v416_v5  ;;  %v417_v59 = vadd.f32 %v353_v28, %v200_v27  ;;  %v354_v15 = vmul.f32 %v1134_v43, %v266_v13  ;;  %v849_v60 = vadd.f32 %v785_v30, %v632_v38 }
  0x8a   :  { %912 = vst [vmem:[#allocation7 + $0x1d8] sm:$0xff] %v848_v58  ;;  %v571_v1 = vmul.f32 %v1137_v55, %v483_v48  ;;  %v788_v49 = vmul.f32 %v1139_v56, %v700_v9 }
  0x8b   :  { %v850_v2 = vadd.f32 %v786_v31, %v633_v41  ;;  %v634_v16 = vadd.f32 %v570_v14, %v417_v59  ;;  %v418_v19 = vadd.f32 %v354_v15, %v201_v39  ;;  %913 = vst [vmem:[#allocation7 + $0x1e0] sm:$0xff] %v849_v60 }
  0x8d   :  { %914 = vst [vmem:[#allocation7 + $0x1e8] sm:$0xff] %v850_v2  ;;  %v851_v24 = vadd.f32 %v787_v33, %v634_v16  ;;  %v635_v35 = vadd.f32 %v571_v1, %v418_v19 }
  0x8f   :  { %915 = vst [vmem:[#allocation7 + $0x1f0] sm:$0xff] %v851_v24  ;;  %v852_v42 = vadd.f32 %v788_v49, %v635_v35 }
  0x91   :  { %916 = vst [vmem:[#allocation7 + $0x1f8] sm:$0xff] %v852_v42 }
  0x92   :  { %929 = dma.vmem_to_hbm [thread:$0]  %s922_s1, 8192, %s924_s23, [#allocation4], %s1022_s19, %s1022_s19, %s1023_s20  }
  0x93   :  { %1018 = dma.done.wait [#allocation4], 8192  }
  0x94   :  { %1019 = vsyncadd [#allocation4], 4294959104 }
  0x95   :  { %934 = vsyncpa [#allocation3], 1 }
  0x96   :  { %935 = vsyncpa [#allocation6], 1 }
  0x97   :  { %936 = vsyncpa [#allocation4], 1 }

</bundles_post_ra>
